<compile_context>
chip_gen: v5e
topology: v5e:2x2
jax: 0.10.0
libtpu: 0.0.40
codegen_flags: <defaults>
</compile_context>

<pallas_src>
import functools

import jax
import jax.numpy as jnp
from jax import lax
from jax.experimental import pallas as pl
from jax.experimental.pallas import tpu as pltpu


def _round_up(x, m):
    return ((x + m - 1) // m) * m


def _vmem_budget_and_limit():
    """(working-set budget, vmem_limit_bytes) chosen per TPU generation."""
    cap = None
    try:
        info = pltpu.get_tpu_info()
        cap = getattr(info, "vmem_capacity_bytes", None)
    except Exception:
        cap = None
    if cap is None:
        # Unknown chip: conservative numbers that are safe everywhere.
        return 24 * (2 ** 20), 48 * (2 ** 20)
    if cap >= 100 * (2 ** 20):
        # v5e / v6e: 128 MiB physical VMEM -> use big blocks.
        return 48 * (2 ** 20), 80 * (2 ** 20)
    # v7x-class: 64 MiB physical per TensorCore -> tighter ceiling.
    return 28 * (2 ** 20), 48 * (2 ** 20)


def _choose_batch_tile(B, C, in_itemsize, budget_bytes):
    """Largest batch tile whose working set fits the VMEM budget."""
    sublane = 16 if in_itemsize == 2 else 8
    lane_c = max(_round_up(C, 128), 128)
    # Per row: double-buffered logits block + ~4 f32-wide (TB, C) temps
    # (upcast/shifted, exp, iota, select) + lane-padded (TB, 1)-column temps
    # (labels, output, m/lse/g/s etc. each pad to 128 lanes).
    per_row = lane_c * (2 * in_itemsize + 4 * 4) + 8 * 128 * 4
    tile = budget_bytes // per_row
    tile = (tile // sublane) * sublane
    tile = max(sublane, tile)
    tile = min(tile, _round_up(B, sublane))
    return int(tile)


def _smoothed_ce_kernel(labels_ref, logits_ref, loss_ref, *, p, q, num_classes):
    x = logits_ref[...].astype(jnp.float32)             # (TB, C)
    labels = labels_ref[...]                             # (TB, 1) int32

    # Numerically stable log-softmax pieces (log_probs itself is NOT built).
    m = jnp.max(x, axis=-1, keepdims=True)               # (TB, 1)
    shifted = x - m                                       # (TB, C)
    lse = jnp.log(jnp.sum(jnp.exp(shifted), axis=-1, keepdims=True))  # (TB, 1)

    # Fused select-reduce gather on the VPU (no one-hot materialization).
    col_ids = lax.broadcasted_iota(jnp.int32, shifted.shape, 1)
    g = jnp.sum(jnp.where(col_ids == labels, shifted, 0.0),
                axis=-1, keepdims=True)                   # (TB, 1)
    gathered = g - lse                                    # log_probs[i, labels[i]]

    if q != 0.0:
        s = jnp.sum(shifted, axis=-1, keepdims=True)      # (TB, 1)
        sum_probs = s - num_classes * lse                 # sum_j log_probs[i, j]
        loss = p * gathered + q * (sum_probs - gathered)
    else:
        # smoothing == 0: skip the whole row-sum path (baked at trace time).
        loss = p * gathered

    loss_ref[...] = -loss


def smoothed_cross_entropy_loss(logits, labels, smoothing=0.0, *, batch_tile=None):
    """Pallas TPU implementation of SmoothedCrossEntropyLoss.forward."""
    B, C = logits.shape
    n = C - 1.0
    p = 1.0 - float(smoothing)
    q = (float(smoothing) / n) if (smoothing != 0.0 and n > 0.0) else 0.0

    itemsize = jnp.dtype(logits.dtype).itemsize
    budget, vmem_limit = _vmem_budget_and_limit()
    if batch_tile is None:
        batch_tile = _choose_batch_tile(B, C, itemsize, budget)
    else:
        batch_tile = _round_up(int(batch_tile), 16 if itemsize == 2 else 8)

    num_tiles = pl.cdiv(B, batch_tile)
    labels2d = labels.astype(jnp.int32).reshape(B, 1)

    kernel = functools.partial(
        _smoothed_ce_kernel, p=p, q=q, num_classes=float(C)
    )

    # NOTE: the last grid step may be ragged (B % batch_tile != 0). Its
    # out-of-range input rows hold unspecified data, but the output array is
    # exactly (B, 1), so Pallas masks those rows' writes and they can never
    # reach the final sum. No padding copy, no [:B] slice needed.
    per_row_loss = pl.pallas_call(
        kernel,
        out_shape=jax.ShapeDtypeStruct((B, 1), jnp.float32),
        grid_spec=pltpu.PrefetchScalarGridSpec(
            num_scalar_prefetch=0,
            grid=(num_tiles,),
            in_specs=[
                pl.BlockSpec((batch_tile, 1), lambda i: (i, 0)),   # labels
                pl.BlockSpec((batch_tile, C), lambda i: (i, 0)),   # logits
            ],
            out_specs=pl.BlockSpec((batch_tile, 1), lambda i: (i, 0)),
        ),
        compiler_params=pltpu.CompilerParams(
            dimension_semantics=("parallel",),   # each tile owns its output block
            vmem_limit_bytes=vmem_limit,
        ),
    )(labels2d, logits)

    # Final tiny reduction (B floats) in plain JAX.
    return jnp.sum(per_row_loss)


def _reference(logits, labels, smoothing):
    log_probs = jax.nn.log_softmax(logits.astype(jnp.float32), axis=-1)
    loss = log_probs[jnp.arange(labels.shape[0]), labels]
    n = logits.shape[-1] - 1.0
    p = 1.0 - smoothing
    q = smoothing / n if smoothing != 0.0 else 0.0
    sum_probs = jnp.sum(log_probs, axis=-1)
    loss = p * loss + q * (sum_probs - loss)
    return -jnp.sum(loss)


if __name__ == "__main__":
    key = jax.random.PRNGKey(0)
    k1, k2, k3, k4, k5, k6 = jax.random.split(key, 6)

    # Case 1: small, exact tile fit (matches the module's typical use).
    B, C = 8, 32
    smoothing = 0.1
    logits = jax.random.normal(k1, (B, C), dtype=jnp.float32)
    labels = jax.random.randint(k2, (B,), 0, C, dtype=jnp.int32)
    out = jax.block_until_ready(smoothed_cross_entropy_loss(logits, labels, smoothing))
    ref = _reference(logits, labels, smoothing)
    assert jnp.allclose(out, ref, rtol=1e-5, atol=1e-5), (out, ref)

    # Case 2: smoothing == 0 (q-path elided) and B not a multiple of the tile
    # (exercises the ragged last block without any padding copy).
    B2, C2 = 50, 96
    logits2 = jax.random.normal(k3, (B2, C2), dtype=jnp.float32)
    labels2 = jax.random.randint(k4, (B2,), 0, C2, dtype=jnp.int32)
    out2 = jax.block_until_ready(smoothed_cross_entropy_loss(logits2, labels2, 0.0))
    ref2 = _reference(logits2, labels2, 0.0)
    assert jnp.allclose(out2, ref2, rtol=1e-5, atol=1e-5), (out2, ref2)

    # Case 3: bf16 logits, forced small tile -> multiple grid steps.
    B3, C3 = 64, 256
    logits3 = jax.random.normal(k5, (B3, C3), dtype=jnp.float32).astype(jnp.bfloat16)
    labels3 = jax.random.randint(k6, (B3,), 0, C3, dtype=jnp.int32)
    out3 = jax.block_until_ready(
        smoothed_cross_entropy_loss(logits3, labels3, 0.1, batch_tile=16)
    )
    ref3 = _reference(logits3, labels3, 0.1)
    assert jnp.allclose(out3, ref3, rtol=2e-3, atol=2e-3), (out3, ref3)

    print("KERNEL_OK")
</pallas_src>

<mosaic_0001>
module attributes {stable_mosaic.version = 11 : i64} {
  func.func @_smoothed_ce_kernel(%arg0: i32, %arg1: memref<8x1xi32, #tpu.memory_space<vmem>>, %arg2: memref<8x32xf32, #tpu.memory_space<vmem>>, %arg3: memref<8x1xf32, #tpu.memory_space<vmem>>) attributes {dimension_semantics = [#tpu.dimension_semantics<parallel>], iteration_bounds = array<i64: 1>, scalar_prefetch = 0 : i64, scratch_operands = 0 : i64, tpu.core_type = #tpu.core_type<tc>, window_params = [{transform_indices = @transform_0, window_bounds = array<i64: 8, 1>}, {transform_indices = @transform_1, window_bounds = array<i64: 8, 32>}, {transform_indices = @transform_2, window_bounds = array<i64: 8, 1>}]} {
    %c0 = arith.constant 0 : index
    %c0_0 = arith.constant 0 : index
    %0 = vector.load %arg2[%c0, %c0_0] : memref<8x32xf32, #tpu.memory_space<vmem>>, vector<8x32xf32>
    %c0_1 = arith.constant 0 : index
    %c0_2 = arith.constant 0 : index
    %1 = vector.load %arg1[%c0_1, %c0_2] : memref<8x1xi32, #tpu.memory_space<vmem>>, vector<8x1xi32>
    %cst = arith.constant dense<0xFF800000> : vector<8xf32>
    %2 = vector.multi_reduction <maximumf>, %0, %cst [1] : vector<8x32xf32> to vector<8xf32>
    %3 = vector.shape_cast %2 : vector<8xf32> to vector<8x1xf32>
    %4 = vector.broadcast %3 : vector<8x1xf32> to vector<8x32xf32>
    %5 = arith.subf %0, %4 : vector<8x32xf32>
    %6 = math.exp %5 : vector<8x32xf32>
    %cst_3 = arith.constant dense<0.000000e+00> : vector<8xf32>
    %7 = vector.multi_reduction <add>, %6, %cst_3 [1] : vector<8x32xf32> to vector<8xf32>
    %8 = vector.shape_cast %7 : vector<8xf32> to vector<8x1xf32>
    %9 = math.log %8 : vector<8x1xf32>
    %10 = tpu.iota {dimensions = array<i32: 1>} : vector<8x32xi32>
    %11 = vector.broadcast %1 : vector<8x1xi32> to vector<8x32xi32>
    %12 = arith.cmpi eq, %10, %11 : vector<8x32xi32>
    %cst_4 = arith.constant 0.000000e+00 : f32
    %13 = vector.broadcast %cst_4 : f32 to vector<8x32xf32>
    %14 = arith.select %12, %5, %13 : vector<8x32xi1>, vector<8x32xf32>
    %cst_5 = arith.constant dense<0.000000e+00> : vector<8xf32>
    %15 = vector.multi_reduction <add>, %14, %cst_5 [1] : vector<8x32xf32> to vector<8xf32>
    %16 = vector.shape_cast %15 : vector<8xf32> to vector<8x1xf32>
    %17 = arith.subf %16, %9 : vector<8x1xf32>
    %cst_6 = arith.constant dense<0.000000e+00> : vector<8xf32>
    %18 = vector.multi_reduction <add>, %5, %cst_6 [1] : vector<8x32xf32> to vector<8xf32>
    %19 = vector.shape_cast %18 : vector<8xf32> to vector<8x1xf32>
    %cst_7 = arith.constant 3.200000e+01 : f32
    %20 = vector.broadcast %cst_7 : f32 to vector<8x1xf32>
    %21 = arith.mulf %20, %9 : vector<8x1xf32>
    %22 = arith.subf %19, %21 : vector<8x1xf32>
    %cst_8 = arith.constant 0.899999976 : f32
    %23 = vector.broadcast %cst_8 : f32 to vector<8x1xf32>
    %24 = arith.mulf %23, %17 : vector<8x1xf32>
    %25 = arith.subf %22, %17 : vector<8x1xf32>
    %cst_9 = arith.constant 0.0032258064 : f32
    %26 = vector.broadcast %cst_9 : f32 to vector<8x1xf32>
    %27 = arith.mulf %26, %25 : vector<8x1xf32>
    %28 = arith.addf %24, %27 : vector<8x1xf32>
    %cst_10 = arith.constant 0.000000e+00 : f32
    %29 = vector.broadcast %cst_10 : f32 to vector<8x1xf32>
    %30 = arith.subf %29, %28 : vector<8x1xf32>
    %c0_11 = arith.constant 0 : index
    %c0_12 = arith.constant 0 : index
    %31 = vector.load %arg3[%c0_11, %c0_12] : memref<8x1xf32, #tpu.memory_space<vmem>>, vector<8x1xf32>
    tpu.vector_store %arg3[%c0_11, %c0_12], %30 {strides = array<i32>} : memref<8x1xf32, #tpu.memory_space<vmem>>, vector<8x1xf32>,
    return
  }
  func.func @transform_0(%arg0: i32) -> (i32, i32) {
    %c0_i32 = arith.constant 0 : i32
    %c0_i32_0 = arith.constant 0 : i32
    return %arg0, %c0_i32 : i32, i32
  }
  func.func @transform_1(%arg0: i32) -> (i32, i32) {
    %c0_i32 = arith.constant 0 : i32
    %c0_i32_0 = arith.constant 0 : i32
    return %arg0, %c0_i32 : i32, i32
  }
  func.func @transform_2(%arg0: i32) -> (i32, i32) {
    %c0_i32 = arith.constant 0 : i32
    %c0_i32_0 = arith.constant 0 : i32
    return %arg0, %c0_i32 : i32, i32
  }
}

</mosaic_0001>

<bundles_post_ra>
// kernel: tpu_custom_call.1
= control target key start
LH: loop header
LB: loop body
LE: loop exit
PB: predicated region body
PF: predicated region fallthrough
CT: control target
= control target key end

     0   :  { %vm13_vm0 = vcmask 261120   ;;  %v58_v1 = vmov 0   ;;  %v25_v10 = vlaneseq  ;;  %vm46_vm2 = vcmask 7168   ;;  %s87_s1 = inlined_call_operand.vmem [shape: f32[8,32], index: 1, kind: input, shape index: {}]   ;;  %s88_s0 = inlined_call_operand.vmem [shape: s32[8,1], index: 0, kind: input, shape index: {}]   ;;  %s89_s2 = inlined_call_operand.vmem [shape: f32[8,1], index: 2, kind: output, shape index: {}]  }
   0x1   :  { %v11_v0 = vld [vmem:[%s87_s1] sm:$0xff]  ;;  %53 = vset.pattern.permute.xlu0 %v58_v1 }
   0x2   :  { %v14_v2 = vsel %vm13_vm0, %v11_v0, -inf  ;;  %v12_v3 = vld [vmem:[%s88_s0] sm:$0xff]  ;;  %v26_v11 = vand.u32 127, %v25_v10 }
   0x3   :  { %15 = vmax.xlane.f32.xlu0 %v14_v2 }
  0x17   :  { %28 = vperm.xlu0 %53, %v12_v3  }
  0x76   :  { %v16_v4 = vpop.xlane.xlu0 %15 }
  0x77   :  { %v17_v5 = vsub.f32 %v11_v0, %v16_v4 }
  0x79   :  { %v18_v6 = vmul.f32 1.442695, %v17_v5  ;;  %v36_v7 = vsel %vm13_vm0, %v17_v5, 0.0 }
  0x7a   :  { %37 = vadd.xlane.f32.xlu2 %v36_v7 }
  0x7b   :  { %54 = vpow2.f32 %v18_v6 }
  0x81   :  { %v55_v8 = vpop.eup %54 }
  0x82   :  { %v20_v9 = vsel %vm13_vm0, %v55_v8, 0.0 }
  0x83   :  { %21 = vadd.xlane.f32.xlu1 %v20_v9 }
  0x89   :  { %v29_v12 = vpop.permute.xlu0 %28 }
  0x8a   :  { %vm30_vm1 = vcmp.eq.s32.totalorder %v26_v11, %v29_v12 }
  0x8b   :  { %v31_v13 = vsel %vm30_vm1, %v17_v5, 0.0 }
  0x8c   :  { %v32_v14 = vsel %vm13_vm0, %v31_v13, 0.0 }
  0x8d   :  { %33 = vadd.xlane.f32.xlu1 %v32_v14 }
  0xed   :  { %v38_v20 = vpop.xlane.xlu2 %37 }
  0xf6   :  { %v22_v15 = vpop.xlane.xlu1 %21 }
  0xf7   :  { %56 = vlog2.f32 %v22_v15 }
  0xfd   :  { %v57_v16 = vpop.eup %56 }
  0xfe   :  { %v24_v17 = vmul.f32 0.6931472, %v57_v16 }
 0x100   :  { %v39_v18 = vmul.f32 32.0, %v24_v17  ;;  %v34_v19 = vpop.xlane.xlu1 %33 }
 0x101   :  { %v35_v21 = vsub.f32 %v34_v19, %v24_v17 }
 0x102   :  { %v40_v22 = vsub.f32 %v38_v20, %v39_v18 }
 0x103   :  { %v41_v24 = vmul.f32 0.9, %v35_v21 }
 0x104   :  { %v42_v23 = vsub.f32 %v40_v22, %v35_v21 }
 0x106   :  { %v43_v25 = vmul.f32 0.0032258064, %v42_v23 }
 0x108   :  { %v44_v26 = vadd.f32 %v43_v25, %v41_v24 }
 0x10a   :  { %v45_v27 = vsub.f32 0.0, %v44_v26 }
 0x10c   :  { %47 = vst.msk [vmem:[%s89_s2] sm:$0xff] %vm46_vm2, %v45_v27 }

</bundles_post_ra>
